<compile_context>
chip_gen: v7x
topology: tpu7x:2x2x1
jax: 0.10.0
libtpu: 0.0.40
codegen_flags: <defaults>
</compile_context>

<pallas_src>
import jax
import jax.numpy as jnp
from jax.experimental import pallas as pl
from jax.experimental.pallas import tpu as pltpu


def _round_up(n, m):
    return ((n + m - 1) // m) * m


def critic_kernel(xt_ref, w1_ref, b1_ref, w2_ref, b2_ref, w3_ref, b3_ref, o_ref):
    xt = xt_ref[...]                                                  # [S, TB]

    # fc1 + ReLU : [H, S] @ [S, TB] -> [H, TB]
    h1 = jnp.dot(w1_ref[...], xt, preferred_element_type=jnp.float32)
    h1 = jnp.maximum(h1 + b1_ref[...], 0.0)

    # fc2 + ReLU : [H, H] @ [H, TB] -> [H, TB]
    h2 = jnp.dot(w2_ref[...], h1, preferred_element_type=jnp.float32)
    h2 = jnp.maximum(h2 + b2_ref[...], 0.0)

    # fc3 (out_features == 1) + ReLU: VPU multiply + sublane reduce instead of
    # a padded [*,H]@[H,1] MXU pass -> lane-dense [1, TB] result.
    y = jnp.sum(h2 * w3_ref[...], axis=0, keepdims=True) + b3_ref[...]  # [1, TB]
    o_ref[...] = jnp.maximum(y, 0.0).astype(o_ref.dtype)


def critic_forward(x, params, *, tb=512):
    """x: [B, s_size] float32. params: w1 [H,S], b1 [H,1], w2 [H,H], b2 [H,1],
    w3 [1,H] stored as [H,1] column, b3 [1,1].  Returns [B, 1] float32."""
    w1, b1 = params["w1"], params["b1"]
    w2, b2 = params["w2"], params["b2"]
    w3, b3 = params["w3"], params["b3"]

    B, S = x.shape
    H = w1.shape[0]

    # Batch tile: multiple of 128 (lane width), clamped to padded batch.
    b_pad = max(_round_up(B, 128), 128)
    tb = max(128, min(_round_up(tb, 128), b_pad))
    b_pad = _round_up(b_pad, tb)
    num_tiles = b_pad // tb

    # Feature-major, batch-on-lanes input; zero-pad the batch axis.
    xt = jnp.zeros((S, b_pad), x.dtype).at[:, :B].set(x.T)

    resident = lambda a: pl.BlockSpec(a.shape, lambda i: (0,) * a.ndim)

    out = pl.pallas_call(
        critic_kernel,
        out_shape=jax.ShapeDtypeStruct((1, b_pad), jnp.float32),
        grid=(num_tiles,),
        in_specs=[
            pl.BlockSpec((S, tb), lambda i: (0, i)),   # x^T streamed over batch
            resident(w1), resident(b1),
            resident(w2), resident(b2),
            resident(w3), resident(b3),
        ],
        out_specs=pl.BlockSpec((1, tb), lambda i: (0, i)),  # lane-dense output
        compiler_params=pltpu.CompilerParams(
            dimension_semantics=("parallel",),
            vmem_limit_bytes=64 * 1024 * 1024,
        ),
    )(xt, w1, b1, w2, b2, w3, b3)

    return out[0, :B].reshape(B, 1)


def init_params(key, s_size, h_size):
    """Deterministic init mirroring nn.Linear's uniform(-1/sqrt(fan_in), ...).
    Weights are kept in PyTorch-native [out, in] layout; biases as [out, 1]."""
    ks = jax.random.split(key, 6)

    def linear(kw, kb, fan_in, fan_out):
        bound = 1.0 / jnp.sqrt(fan_in)
        w = jax.random.uniform(kw, (fan_out, fan_in), jnp.float32, -bound, bound)
        b = jax.random.uniform(kb, (fan_out, 1), jnp.float32, -bound, bound)
        return w, b

    w1, b1 = linear(ks[0], ks[1], s_size, h_size)
    w2, b2 = linear(ks[2], ks[3], h_size, h_size)
    w3, b3 = linear(ks[4], ks[5], h_size, 1)
    # Store fc3 weight as a column [H, 1] for the in-kernel VPU reduce.
    return {"w1": w1, "b1": b1, "w2": w2, "b2": b2, "w3": w3.T, "b3": b3}


def reference_forward(x, p):
    h1 = jnp.maximum(x @ p["w1"].T + p["b1"].T, 0.0)
    h2 = jnp.maximum(h1 @ p["w2"].T + p["b2"].T, 0.0)
    return jnp.maximum(h2 @ p["w3"] + p["b3"].T, 0.0)


if __name__ == "__main__":
    key = jax.random.PRNGKey(0)
    k_x, k_p = jax.random.split(key)

    B, s_size, h_size = 4, 8, 32
    x = jax.random.normal(k_x, (B, s_size), jnp.float32)
    params = init_params(k_p, s_size, h_size)

    out = critic_forward(x, params)
    out = jax.block_until_ready(out)

    ref = reference_forward(x, params)
    assert out.shape == (B, 1)
    assert jnp.allclose(out, ref, atol=1e-5, rtol=1e-5)

    print("KERNEL_OK")
</pallas_src>

<mosaic_0001>
module attributes {stable_mosaic.version = 11 : i64} {
  func.func @critic_kernel(%arg0: i32, %arg1: memref<8x128xf32, #tpu.memory_space<vmem>>, %arg2: memref<32x8xf32, #tpu.memory_space<vmem>>, %arg3: memref<32x1xf32, #tpu.memory_space<vmem>>, %arg4: memref<32x32xf32, #tpu.memory_space<vmem>>, %arg5: memref<32x1xf32, #tpu.memory_space<vmem>>, %arg6: memref<32x1xf32, #tpu.memory_space<vmem>>, %arg7: memref<1x1xf32, #tpu.memory_space<vmem>>, %arg8: memref<1x128xf32, #tpu.memory_space<vmem>>) attributes {dimension_semantics = [#tpu.dimension_semantics<parallel>], iteration_bounds = array<i64: 1>, scalar_prefetch = 0 : i64, scratch_operands = 0 : i64, tpu.core_type = #tpu.core_type<tc>, window_params = [{transform_indices = @transform_0, window_bounds = array<i64: 8, 128>}, {pipeline_mode = #tpu.pipeline_mode<synchronous>, transform_indices = @transform_1, window_bounds = array<i64: 32, 8>}, {pipeline_mode = #tpu.pipeline_mode<synchronous>, transform_indices = @transform_2, window_bounds = array<i64: 32, 1>}, {pipeline_mode = #tpu.pipeline_mode<synchronous>, transform_indices = @transform_3, window_bounds = array<i64: 32, 32>}, {pipeline_mode = #tpu.pipeline_mode<synchronous>, transform_indices = @transform_4, window_bounds = array<i64: 32, 1>}, {pipeline_mode = #tpu.pipeline_mode<synchronous>, transform_indices = @transform_5, window_bounds = array<i64: 32, 1>}, {pipeline_mode = #tpu.pipeline_mode<synchronous>, transform_indices = @transform_6, window_bounds = array<i64: 1, 1>}, {transform_indices = @transform_7, window_bounds = array<i64: 1, 128>}]} {
    %c0 = arith.constant 0 : index
    %c0_0 = arith.constant 0 : index
    %0 = vector.load %arg1[%c0, %c0_0] : memref<8x128xf32, #tpu.memory_space<vmem>>, vector<8x128xf32>
    %c0_1 = arith.constant 0 : index
    %c0_2 = arith.constant 0 : index
    %1 = vector.load %arg2[%c0_1, %c0_2] : memref<32x8xf32, #tpu.memory_space<vmem>>, vector<32x8xf32>
    %cst = arith.constant dense<0.000000e+00> : vector<32x128xf32>
    %2 = tpu.matmul %1, %0, %cst {dimension_numbers = #tpu.dot_dimension_numbers<[1], [0], [0], [1], [0, 0, 1, 1], [], []>} : vector<32x8xf32>, vector<8x128xf32>, vector<32x128xf32> -> vector<32x128xf32>
    %c0_3 = arith.constant 0 : index
    %c0_4 = arith.constant 0 : index
    %3 = vector.load %arg3[%c0_3, %c0_4] : memref<32x1xf32, #tpu.memory_space<vmem>>, vector<32x1xf32>
    %4 = vector.broadcast %3 : vector<32x1xf32> to vector<32x128xf32>
    %5 = arith.addf %2, %4 : vector<32x128xf32>
    %cst_5 = arith.constant 0.000000e+00 : f32
    %6 = vector.broadcast %cst_5 : f32 to vector<32x128xf32>
    %7 = arith.maximumf %5, %6 : vector<32x128xf32>
    %c0_6 = arith.constant 0 : index
    %c0_7 = arith.constant 0 : index
    %8 = vector.load %arg4[%c0_6, %c0_7] : memref<32x32xf32, #tpu.memory_space<vmem>>, vector<32x32xf32>
    %cst_8 = arith.constant dense<0.000000e+00> : vector<32x128xf32>
    %9 = tpu.matmul %8, %7, %cst_8 {dimension_numbers = #tpu.dot_dimension_numbers<[1], [0], [0], [1], [0, 0, 1, 1], [], []>} : vector<32x32xf32>, vector<32x128xf32>, vector<32x128xf32> -> vector<32x128xf32>
    %c0_9 = arith.constant 0 : index
    %c0_10 = arith.constant 0 : index
    %10 = vector.load %arg5[%c0_9, %c0_10] : memref<32x1xf32, #tpu.memory_space<vmem>>, vector<32x1xf32>
    %11 = vector.broadcast %10 : vector<32x1xf32> to vector<32x128xf32>
    %12 = arith.addf %9, %11 : vector<32x128xf32>
    %cst_11 = arith.constant 0.000000e+00 : f32
    %13 = vector.broadcast %cst_11 : f32 to vector<32x128xf32>
    %14 = arith.maximumf %12, %13 : vector<32x128xf32>
    %c0_12 = arith.constant 0 : index
    %c0_13 = arith.constant 0 : index
    %15 = vector.load %arg6[%c0_12, %c0_13] : memref<32x1xf32, #tpu.memory_space<vmem>>, vector<32x1xf32>
    %16 = vector.broadcast %15 : vector<32x1xf32> to vector<32x128xf32>
    %17 = arith.mulf %14, %16 : vector<32x128xf32>
    %cst_14 = arith.constant dense<0.000000e+00> : vector<128xf32>
    %18 = vector.multi_reduction <add>, %17, %cst_14 [0] : vector<32x128xf32> to vector<128xf32>
    %19 = vector.shape_cast %18 : vector<128xf32> to vector<1x128xf32>
    %c0_15 = arith.constant 0 : index
    %c0_16 = arith.constant 0 : index
    %20 = vector.load %arg7[%c0_15, %c0_16] : memref<1x1xf32, #tpu.memory_space<vmem>>, vector<1x1xf32>
    %21 = vector.broadcast %20 : vector<1x1xf32> to vector<1x128xf32>
    %22 = arith.addf %19, %21 : vector<1x128xf32>
    %cst_17 = arith.constant 0.000000e+00 : f32
    %23 = vector.broadcast %cst_17 : f32 to vector<1x128xf32>
    %24 = arith.maximumf %22, %23 : vector<1x128xf32>
    %c0_18 = arith.constant 0 : index
    %c0_19 = arith.constant 0 : index
    %25 = vector.load %arg8[%c0_18, %c0_19] : memref<1x128xf32, #tpu.memory_space<vmem>>, vector<1x128xf32>
    tpu.vector_store %arg8[%c0_18, %c0_19], %24 {strides = array<i32>} : memref<1x128xf32, #tpu.memory_space<vmem>>, vector<1x128xf32>,
    return
  }
  func.func @transform_0(%arg0: i32) -> (i32, i32) {
    %c0_i32 = arith.constant 0 : i32
    %c0_i32_0 = arith.constant 0 : i32
    return %c0_i32, %arg0 : i32, i32
  }
  func.func @transform_1(%arg0: i32) -> (i32, i32) {
    %c0_i32 = arith.constant 0 : i32
    %c0_i32_0 = arith.constant 0 : i32
    %c0_i32_1 = arith.constant 0 : i32
    return %c0_i32, %c0_i32_0 : i32, i32
  }
  func.func @transform_2(%arg0: i32) -> (i32, i32) {
    %c0_i32 = arith.constant 0 : i32
    %c0_i32_0 = arith.constant 0 : i32
    %c0_i32_1 = arith.constant 0 : i32
    return %c0_i32, %c0_i32_0 : i32, i32
  }
  func.func @transform_3(%arg0: i32) -> (i32, i32) {
    %c0_i32 = arith.constant 0 : i32
    %c0_i32_0 = arith.constant 0 : i32
    %c0_i32_1 = arith.constant 0 : i32
    return %c0_i32, %c0_i32_0 : i32, i32
  }
  func.func @transform_4(%arg0: i32) -> (i32, i32) {
    %c0_i32 = arith.constant 0 : i32
    %c0_i32_0 = arith.constant 0 : i32
    %c0_i32_1 = arith.constant 0 : i32
    return %c0_i32, %c0_i32_0 : i32, i32
  }
  func.func @transform_5(%arg0: i32) -> (i32, i32) {
    %c0_i32 = arith.constant 0 : i32
    %c0_i32_0 = arith.constant 0 : i32
    %c0_i32_1 = arith.constant 0 : i32
    return %c0_i32, %c0_i32_0 : i32, i32
  }
  func.func @transform_6(%arg0: i32) -> (i32, i32) {
    %c0_i32 = arith.constant 0 : i32
    %c0_i32_0 = arith.constant 0 : i32
    %c0_i32_1 = arith.constant 0 : i32
    return %c0_i32, %c0_i32_0 : i32, i32
  }
  func.func @transform_7(%arg0: i32) -> (i32, i32) {
    %c0_i32 = arith.constant 0 : i32
    %c0_i32_0 = arith.constant 0 : i32
    return %c0_i32, %arg0 : i32, i32
  }
}

</mosaic_0001>

<bundles_post_ra>
// kernel: tpu_custom_call.1
= control target key start
LH: loop header
LB: loop body
LE: loop exit
PB: predicated region body
PF: predicated region fallthrough
CT: control target
= control target key end

     0   :  { %s829_s0 = inlined_call_operand.hbm [shape: f32[8,128], index: 0, kind: input, shape index: {}]   ;;  %s830_s1 = inlined_call_operand.hbm [shape: f32[32,8], index: 1, kind: input, shape index: {}]   ;;  %s831_s2 = inlined_call_operand.hbm [shape: f32[32,1], index: 2, kind: input, shape index: {}]   ;;  %s832_s3 = inlined_call_operand.hbm [shape: f32[32,32], index: 3, kind: input, shape index: {}]   ;;  %s833_s4 = inlined_call_operand.hbm [shape: f32[32,1], index: 4, kind: input, shape index: {}]   ;;  %s834_s5 = inlined_call_operand.hbm [shape: f32[32,1], index: 5, kind: input, shape index: {}]   ;;  %s835_s6 = inlined_call_operand.<no memory space> [shape: f32[1,1], index: 6, kind: input, shape index: {}]   ;;  %s836_s7 = inlined_call_operand.hbm [shape: f32[1,128], index: 7, kind: output, shape index: {}]  }
   0x1   :  { %v12_v0 = vstv %s835_s6 }
   0x2   :  { %13 = vst [vmem:[#allocation2] sm:$0x1] %v12_v0 }
   0x3   :  { %14 = vsyncpa [#allocation4], 0 }
   0x4   :  { %15 = vsyncpa [#allocation7], 0 }
   0x5   :  { %16 = vsyncpa [#allocation10], 0 }
   0x6   :  { %17 = vsyncpa [#allocation13], 0 }
   0x7   :  { %18 = vsyncpa [#allocation5], 0  ;;  %s669_s26 = smov [#allocation6]   ;;  %s505_s30 = scalar_lea.hbm %s830_s1, 512 }
   0x8   :  { %s34_s27 = sshll.u32 %s669_s26, 4  ;;  %p506_p0 = scmp.ne.s32.totalorder %s830_s1, %s505_s30  ;;  %s35_s27 = int_to_ptr.vmem [resolvable:$true] %s34_s27 }
   0x9   :  { %p509_p1 = scmp.lt.u32.totalorder %s505_s30, %s830_s1 }
   0xb   :  { %p511_p2 = pnand %p509_p1, %p506_p0 }
   0xd   :  { %514 = shalt.err (!%p511_p2)
}
   0xe   :  { %s515_s6 = scalar_lea.vmem %s35_s27, 512  ;;  %p520_p4 = scmp.lt.s32.totalorder %s35_s27, %s35_s27 }
   0xf   :  { %p516_p3 = scmp.ne.s32.totalorder %s35_s27, %s515_s6  ;;  %p521_p5 = scmp.lt.s32.totalorder %s515_s6, %s515_s6 }
  0x11   :  { %p522_p6 = por %p521_p5, %p520_p4 }
  0x13   :  { %p523_p7 = pnand %p522_p6, %p516_p3 }
  0x15   :  { %526 = shalt.err (!%p523_p7)
}
  0x16   :  { %s670_s12 = smov 128   ;;  %s671_s13 = smov 8  }
  0x17   :  { %40 = dma.hbm_to_vmem [thread:$0]  %s830_s1, 512, %s35_s27, [#allocation7], %s670_s12, %s670_s12, %s671_s13  }
  0x18   :  { %s672_s16 = smov [#allocation9]   ;;  %s673_s18 = smov [#allocation3]  }
  0x19   :  { %s58_s17 = sshll.u32 %s672_s16, 4  ;;  %s25_s19 = sshll.u32 %s673_s18, 4  ;;  %s59_s17 = int_to_ptr.vmem [resolvable:$true] %s58_s17  ;;  %s26_s19 = int_to_ptr.vmem [resolvable:$true] %s25_s19 }
  0x1a   :  { %s527_s22 = scalar_lea.hbm %s832_s3, 512 }
  0x1b   :  { %p528_p8 = scmp.ne.s32.totalorder %s832_s3, %s527_s22  ;;  %p531_p9 = scmp.lt.u32.totalorder %s527_s22, %s832_s3 }
  0x1d   :  { %p533_p10 = pnand %p531_p9, %p528_p8 }
  0x1f   :  { %536 = shalt.err (!%p533_p10)
}
  0x20   :  { %s537_s1 = scalar_lea.vmem %s59_s17, 512  ;;  %p542_p12 = scmp.lt.s32.totalorder %s59_s17, %s59_s17 }
  0x21   :  { %p538_p11 = scmp.ne.s32.totalorder %s59_s17, %s537_s1  ;;  %p543_p13 = scmp.lt.s32.totalorder %s537_s1, %s537_s1 }
  0x23   :  { %p544_p0 = por %p543_p13, %p542_p12 }
  0x25   :  { %p545_p1 = pnand %p544_p0, %p538_p11 }
  0x27   :  { %548 = shalt.err (!%p545_p1)
}
  0x28   :  { %64 = dma.hbm_to_vmem [thread:$0]  %s832_s3, 512, %s59_s17, [#allocation10], %s670_s12, %s670_s12, %s671_s13  }
  0x29   :  { %s549_s8 = scalar_lea.hbm %s829_s0, 128 }
  0x2a   :  { %p550_p2 = scmp.ne.s32.totalorder %s829_s0, %s549_s8  ;;  %p553_p3 = scmp.lt.u32.totalorder %s549_s8, %s829_s0 }
  0x2c   :  { %p555_p4 = pnand %p553_p3, %p550_p2 }
  0x2e   :  { %558 = shalt.err (!%p555_p4)
}
  0x2f   :  { %s559_s14 = scalar_lea.vmem %s26_s19, 128  ;;  %p564_p6 = scmp.lt.s32.totalorder %s26_s19, %s26_s19 }
  0x30   :  { %p560_p5 = scmp.ne.s32.totalorder %s26_s19, %s559_s14  ;;  %p565_p7 = scmp.lt.s32.totalorder %s559_s14, %s559_s14 }
  0x32   :  { %p566_p8 = por %p565_p7, %p564_p6 }
  0x34   :  { %p567_p9 = pnand %p566_p8, %p560_p5 }
  0x36   :  { %570 = shalt.err (!%p567_p9)
}
  0x37   :  { %28 = dma.hbm_to_vmem [thread:$0]  %s829_s0, 128, %s26_s19, [#allocation4]  }
  0x38   :  { %s674_s16 = smov [#allocation8]   ;;  %s675_s18 = smov [#allocation11]  }
  0x39   :  { %s46_s17 = sshll.u32 %s674_s16, 4  ;;  %s70_s20 = sshll.u32 %s675_s18, 4  ;;  %s47_s17 = int_to_ptr.vmem [resolvable:$true] %s46_s17  ;;  %s71_s20 = int_to_ptr.vmem [resolvable:$true] %s70_s20 }
  0x3a   :  { %s571_s23 = scalar_lea.hbm %s831_s2, 512 }
  0x3b   :  { %p572_p10 = scmp.ne.s32.totalorder %s831_s2, %s571_s23  ;;  %p575_p11 = scmp.lt.u32.totalorder %s571_s23, %s831_s2 }
  0x3d   :  { %p577_p12 = pnand %p575_p11, %p572_p10 }
  0x3f   :  { %580 = shalt.err (!%p577_p12)
}
  0x40   :  { %s581_s0 = scalar_lea.vmem %s47_s17, 512  ;;  %p586_p0 = scmp.lt.s32.totalorder %s47_s17, %s47_s17 }
  0x41   :  { %p582_p13 = scmp.ne.s32.totalorder %s47_s17, %s581_s0  ;;  %p587_p1 = scmp.lt.s32.totalorder %s581_s0, %s581_s0 }
  0x43   :  { %p588_p2 = por %p587_p1, %p586_p0 }
  0x45   :  { %p589_p3 = pnand %p588_p2, %p582_p13 }
  0x47   :  { %592 = shalt.err (!%p589_p3)
}
  0x48   :  { %52 = dma.hbm_to_vmem [thread:$0]  %s831_s2, 512, %s47_s17, [#allocation7], %s670_s12, %s670_s12, %s671_s13  }
  0x49   :  { %s593_s30 = scalar_lea.hbm %s833_s4, 512 }
  0x4a   :  { %p594_p4 = scmp.ne.s32.totalorder %s833_s4, %s593_s30  ;;  %p597_p5 = scmp.lt.u32.totalorder %s593_s30, %s833_s4 }
  0x4c   :  { %p599_p6 = pnand %p597_p5, %p594_p4 }
  0x4e   :  { %602 = shalt.err (!%p599_p6)
}
  0x4f   :  { %s603_s6 = scalar_lea.vmem %s71_s20, 512  ;;  %p608_p8 = scmp.lt.s32.totalorder %s71_s20, %s71_s20 }
  0x50   :  { %p604_p7 = scmp.ne.s32.totalorder %s71_s20, %s603_s6  ;;  %p609_p9 = scmp.lt.s32.totalorder %s603_s6, %s603_s6 }
  0x52   :  { %p610_p10 = por %p609_p9, %p608_p8 }
  0x54   :  { %p611_p11 = pnand %p610_p10, %p604_p7 }
  0x56   :  { %614 = shalt.err (!%p611_p11)
}
  0x57   :  { %76 = dma.hbm_to_vmem [thread:$0]  %s833_s4, 512, %s71_s20, [#allocation10], %s670_s12, %s670_s12, %s671_s13  }
  0x58   :  { %s676_s3 = smov [#allocation12]   ;;  %s615_s18 = scalar_lea.hbm %s834_s5, 512 }
  0x59   :  { %s82_s15 = sshll.u32 %s676_s3, 4  ;;  %p616_p12 = scmp.ne.s32.totalorder %s834_s5, %s615_s18  ;;  %s83_s15 = int_to_ptr.vmem [resolvable:$true] %s82_s15 }
  0x5a   :  { %p619_p13 = scmp.lt.u32.totalorder %s615_s18, %s834_s5 }
  0x5c   :  { %p621_p0 = pnand %p619_p13, %p616_p12 }
  0x5e   :  { %624 = shalt.err (!%p621_p0)
}
  0x5f   :  { %s625_s25 = scalar_lea.vmem %s83_s15, 512  ;;  %p630_p2 = scmp.lt.s32.totalorder %s83_s15, %s83_s15 }
  0x60   :  { %p626_p1 = scmp.ne.s32.totalorder %s83_s15, %s625_s25  ;;  %p631_p3 = scmp.lt.s32.totalorder %s625_s25, %s625_s25 }
  0x62   :  { %p632_p4 = por %p631_p3, %p630_p2 }
  0x64   :  { %p633_p5 = pnand %p632_p4, %p626_p1 }
  0x66   :  { %636 = shalt.err (!%p633_p5)
}
  0x67   :  { %88 = dma.hbm_to_vmem [thread:$0]  %s834_s5, 512, %s83_s15, [#allocation13], %s670_s12, %s670_s12, %s671_s13  }
  0x68   :  { %659 = dma.done.wait [#allocation4], 128  }
  0x69   :  { %660 = vsyncadd [#allocation4], 4294967168 }
  0x6a   :  { %661 = dma.done.wait [#allocation7], 1024  }
  0x6b   :  { %662 = vsyncadd [#allocation7], 4294966272 }
  0x6c   :  { %663 = dma.done.wait [#allocation10], 1024  }
  0x6d   :  { %664 = vsyncadd [#allocation10], 4294966272 }
  0x6e   :  { %665 = dma.done.wait [#allocation13], 512  }
  0x6f   :  { %666 = vsyncadd [#allocation13], 4294966784  ;;  %v677_v1 = vmov 0   ;;  %vm138_vm0 = vcmask 64512   ;;  %v109_v2 = vld [vmem:[#allocation3] sm:$0xff]  ;;  %v110_v3 = vld [vmem:[#allocation6] sm:$0xff] }
  0x70   :  { %503 = vset.pattern.permute.xlu0 %v677_v1  ;;  %504 = vset.pattern.permute.xlu1 %v677_v1  ;;  %v111_v4 = vld [vmem:[#allocation6 + $0x8] sm:$0xff]  ;;  %v112_v5 = vld [vmem:[#allocation6 + $0x10] sm:$0xff]  ;;  %v114_v6 = vld [vmem:[#allocation8] sm:$0xff]  ;;  %vm268_vm1 = vcmask 261120   ;;  %s678_s5 = smov [#allocation14]  }
  0x71   :  { %459 = vmatprep.subr.mxu0 %v109_v2  ;;  %461 = vmatprep.mubr.msk.f32.mxu0 %vm138_vm0, %v110_v3  ;;  %v116_v7 = vld [vmem:[#allocation8 + $0x10] sm:$0xff]  ;;  %v115_v8 = vld [vmem:[#allocation8 + $0x8] sm:$0xff]  ;;  %v113_v9 = vld [vmem:[#allocation6 + $0x18] sm:$0xff]  ;;  %s426_s12 = sshll.u32 %s678_s5, 4  ;;  %s427_s12 = int_to_ptr.vmem [resolvable:$true] %s426_s12 }
  0x72   :  { %460 = vmatpush3.msra.mxu0 %v109_v2  ;;  %120 = vperm.xlu0 %503, %v114_v6   ;;  %v117_v10 = vld [vmem:[#allocation8 + $0x18] sm:$0xff]  ;;  %v244_v11 = vld [vmem:[#allocation11] sm:$0xff]  ;;  %v245_v12 = vld [vmem:[#allocation11 + $0x8] sm:$0xff]  ;;  %s637_s13 = scalar_lea.vmem %s427_s12, 16  ;;  %s641_s26 = scalar_lea.vmem %s427_s12, 32 }
  0x73   :  { %462 = vmatmul.mubr.msk.f32.vlgmr.msra.gmra.mrb[0].mxu0 %vm138_vm0, %v111_v4  ;;  %130 = vperm.xlu1 %504, %v116_v7   ;;  %v246_v13 = vld [vmem:[#allocation11 + $0x10] sm:$0xff]  ;;  %v247_v14 = vld [vmem:[#allocation11 + $0x18] sm:$0xff]  ;;  %v370_v15 = vld [vmem:[#allocation12] sm:$0xff]  ;;  %v413_v4 = vlaneseq  ;;  %p638_p6 = scmp.ne.s32.totalorder %s427_s12, %s637_s13  ;;  %p642_p7 = scmp.lt.s32.totalorder %s427_s12, %s427_s12 }
  0x74   :  { %464 = vmatprep.mubr.msk.f32.mxu0 %vm138_vm0, %v112_v5  ;;  %v371_v16 = vld [vmem:[#allocation12 + $0x8] sm:$0xff]  ;;  %v372_v17 = vld [vmem:[#allocation12 + $0x10] sm:$0xff]  ;;  %v373_v18 = vld [vmem:[#allocation12 + $0x18] sm:$0xff]  ;;  %p643_p8 = scmp.lt.s32.totalorder %s641_s26, %s637_s13 }
  0x75   :  { %v407_v19 = vld [vmem:[#allocation2] sm:$0x1]  ;;  %v240_v20 = vld [vmem:[#allocation9] sm:$0xff]  ;;  %v241_v40 = vld [vmem:[#allocation9 + $0x8] sm:$0xff]  ;;  %v414_v7 = vshrl.u32 %v413_v4, 7 }
  0x76   :  { %125 = vperm.xlu0 %503, %v115_v8   ;;  %v242_v21 = vld [vmem:[#allocation9 + $0x10] sm:$0xff]  ;;  %v243_v41 = vld [vmem:[#allocation9 + $0x18] sm:$0xff]  ;;  %p644_p9 = por %p643_p8, %p642_p7 }
  0x77   :  { %465 = vmatmul.mubr.msk.f32.gmra.mrb[2].mxu0 %vm138_vm0, %v113_v9  ;;  %135 = vperm.xlu1 %504, %v117_v10   ;;  %v415_v10 = vsub.s32 0, %v414_v7 }
  0x78   :  { %475 = vmatprep.mubr.msk.f32.mxu0 %vm268_vm1, %v240_v20  ;;  %478 = vmatprep.mubr.msk.f32.mxu1 %vm268_vm1, %v242_v21  ;;  %p645_p10 = pnand %p644_p9, %p638_p6 }
  0x7a   :  { %250 = vperm.xlu0 %503, %v244_v11  }
  0x7b   :  { %255 = vperm.xlu1 %504, %v245_v12  }
  0x7e   :  { %260 = vperm.xlu0 %503, %v246_v13  }
  0x7f   :  { %265 = vperm.xlu1 %504, %v247_v14  }
  0x82   :  { %376 = vperm.xlu0 %503, %v370_v15  }
  0x83   :  { %381 = vperm.xlu1 %504, %v371_v16  }
  0x86   :  { %386 = vperm.xlu0 %503, %v372_v17  }
  0x87   :  { %391 = vperm.xlu1 %504, %v373_v18  }
  0x8a   :  { %410 = vperm.xlu0 %503, %v407_v19  }
  0xf1   :  { %v121_v22 = vpop.permute.xlu0 %120 }
  0xf2   :  { %v131_v23 = vpop.permute.xlu1 %130 }
  0xf5   :  { %v126_v24 = vpop.permute.xlu0 %125 }
  0xf6   :  { %v136_v30 = vpop.permute.xlu1 %135 }
  0xf9   :  { %v251_v42 = vpop.permute.xlu0 %250 }
  0xfa   :  { %v256_v43 = vpop.permute.xlu1 %255 }
  0xfd   :  { %v261_v44 = vpop.permute.xlu0 %260 }
  0xfe   :  { %v266_v45 = vpop.permute.xlu1 %265 }
 0x101   :  { %v377_v46 = vpop.permute.xlu0 %376 }
 0x102   :  { %v382_v55 = vpop.permute.xlu1 %381 }
 0x105   :  { %v387_v62 = vpop.permute.xlu0 %386 }
 0x106   :  { %v392_v1 = vpop.permute.xlu1 %391 }
 0x109   :  { %v411_v12 = vpop.permute.xlu0 %410 }
 0x10a   :  { %v416_v14 = vrot.slane %v411_v12, %v415_v10 }
 0x146   :  { %v463_v25 = vpop.f32.mrb[0].mxu0 }
 0x147   :  { %v223_v26 = vadd.f32 %v463_v25, %v126_v24  ;;  %v217_v27 = vpop.f32.mrb[1].mxu0 }
 0x148   :  { %v218_v28 = vadd.f32 %v217_v27, %v121_v22 }
 0x149   :  { %v237_v29 = vmax.f32 %v223_v26, 0.0 }
 0x14a   :  { %v236_v31 = vmax.f32 %v218_v28, 0.0  ;;  %v466_v32 = vpop.f32.mrb[2].mxu0 }
 0x14b   :  { %v233_v33 = vadd.f32 %v466_v32, %v136_v30  ;;  %v227_v34 = vpop.f32.mrb[3].mxu0 }
 0x14c   :  { %v481_v35 = vpack.c.bf16 %v237_v29, %v236_v31  ;;  %v228_v36 = vadd.f32 %v227_v34, %v131_v23 }
 0x14d   :  { %v239_v37 = vmax.f32 %v233_v33, 0.0 }
 0x14e   :  { %v238_v38 = vmax.f32 %v228_v36, 0.0  ;;  %482 = vmatprep.subr.bf16.mxu0 %v481_v35  ;;  %489 = vmatprep.subr.bf16.mxu1 %v481_v35 }
 0x14f   :  { %484 = vmatpush3.bf16.msra.mxu0 %v481_v35  ;;  %491 = vmatpush3.bf16.msra.mxu1 %v481_v35 }
 0x150   :  { %v485_v39 = vpack.c.bf16 %v239_v37, %v238_v38 }
 0x152   :  { %486 = vmatprep.subr.bf16.mxu0 %v485_v39  ;;  %490 = vmatprep.subr.bf16.mxu1 %v485_v39 }
 0x153   :  { %488 = vmatpush3.bf16.msra.mxu0 %v485_v39  ;;  %492 = vmatpush3.bf16.msra.mxu1 %v485_v39 }
 0x156   :  { %476 = vmatmul.mubr.msk.f32.vlgmr.msra.gmra.mrb[4].mxu0 %vm268_vm1, %v241_v40  ;;  %479 = vmatmul.mubr.msk.f32.vlgmr.msra.gmra.mrb[0].mxu1 %vm268_vm1, %v243_v41 }
 0x229   :  { %v477_v47 = vpop.f32.mrb[4].mxu0  ;;  %v480_v48 = vpop.f32.mrb[0].mxu1 }
 0x22a   :  { %v353_v49 = vadd.f32 %v477_v47, %v256_v43  ;;  %v347_v50 = vpop.f32.mrb[5].mxu0  ;;  %v357_v51 = vpop.f32.mrb[1].mxu1  ;;  %v363_v52 = vadd.f32 %v480_v48, %v266_v45 }
 0x22b   :  { %v348_v53 = vadd.f32 %v347_v50, %v251_v42  ;;  %v358_v54 = vadd.f32 %v357_v51, %v261_v44 }
 0x22c   :  { %v367_v56 = vmax.f32 %v353_v49, 0.0  ;;  %v369_v60 = vmax.f32 %v363_v52, 0.0 }
 0x22d   :  { %v366_v57 = vmax.f32 %v348_v53, 0.0  ;;  %v368_v58 = vmax.f32 %v358_v54, 0.0 }
 0x22e   :  { %v395_v59 = vmul.f32 %v382_v55, %v367_v56  ;;  %v397_v2 = vmul.f32 %v392_v1, %v369_v60 }
 0x22f   :  { %v394_v61 = vmul.f32 %v377_v46, %v366_v57  ;;  %v396_v0 = vmul.f32 %v387_v62, %v368_v58 }
 0x231   :  { %v398_v63 = vadd.f32 %v395_v59, %v394_v61 }
 0x233   :  { %v399_v3 = vadd.f32 %v398_v63, %v396_v0 }
 0x235   :  { %v400_v5 = vadd.f32 %v399_v3, %v397_v2 }
 0x237   :  { %v401_v6 = vrot.slane %v400_v5, 4 }
 0x239   :  { %v402_v8 = vadd.f32 %v401_v6, %v400_v5 }
 0x23b   :  { %v403_v9 = vrot.slane %v402_v8, 2 }
 0x23d   :  { %v404_v11 = vadd.f32 %v403_v9, %v402_v8 }
 0x23f   :  { %v405_v13 = vrot.slane %v404_v11, 1 }
 0x241   :  { %v406_v15 = vadd.f32 %v405_v13, %v404_v11 }
 0x243   :  { %v417_v16 = vadd.f32 %v416_v14, %v406_v15 }
 0x245   :  { %v418_v17 = vmax.f32 %v417_v16, 0.0 }
 0x247   :  { %419 = vst [vmem:[#allocation14] sm:$0x1] %v418_v17 }
 0x248   :  { %648 = shalt.err (!%p645_p10)
}
 0x249   :  { %s649_s19 = scalar_lea.hbm %s836_s7, 16 }
 0x24a   :  { %p650_p11 = scmp.ne.s32.totalorder %s836_s7, %s649_s19  ;;  %p653_p12 = scmp.lt.u32.totalorder %s649_s19, %s836_s7 }
 0x24c   :  { %p655_p13 = pnand %p653_p12, %p650_p11 }
 0x24e   :  { %658 = shalt.err (!%p655_p13)
}
 0x24f   :  { %429 = dma.vmem_to_hbm [thread:$0]  %s427_s12, 16, %s836_s7, [#allocation5]  }
 0x250   :  { %667 = dma.done.wait [#allocation5], 16  }
 0x251   :  { %668 = vsyncadd [#allocation5], 4294967280 }
 0x252   :  { %433 = vsyncpa [#allocation4], 1 }
 0x253   :  { %434 = vsyncpa [#allocation7], 1 }
 0x254   :  { %435 = vsyncpa [#allocation10], 1 }
 0x255   :  { %436 = vsyncpa [#allocation13], 1 }
 0x256   :  { %437 = vsyncpa [#allocation5], 1 }

</bundles_post_ra>
